<compile_context>
chip_gen: v5e
topology: v5e:2x2
jax: 0.10.0
libtpu: 0.0.40
codegen_flags: <defaults>
</compile_context>

<pallas_src>
import functools

import jax
import jax.numpy as jnp
from jax.experimental import pallas as pl
from jax.experimental.pallas import tpu as pltpu

_LANE = 128


def _round_up(n, m):
    return (n + m - 1) // m * m


def autoencoder_kernel(x_ref,
                       w1_ref, b1_ref,
                       w2_ref, b2_ref,
                       w3_ref, b3_ref,
                       w4_ref, b4_ref,
                       o_ref, *, approx_sigmoid):
    """One batch tile of: Linear+ReLU, Linear+ReLU, Linear+ReLU, Linear+Sigmoid."""
    cd = w1_ref.dtype  # MXU operand dtype (f32 or bf16); accumulate in f32.

    x = x_ref[...]
    h = jnp.dot(x, w1_ref[...], preferred_element_type=jnp.float32) + b1_ref[...]
    h = jnp.maximum(h, 0.0)

    h = jnp.dot(h.astype(cd), w2_ref[...],
                preferred_element_type=jnp.float32) + b2_ref[...]
    h = jnp.maximum(h, 0.0)

    h = jnp.dot(h.astype(cd), w3_ref[...],
                preferred_element_type=jnp.float32) + b3_ref[...]
    h = jnp.maximum(h, 0.0)

    y = jnp.dot(h.astype(cd), w4_ref[...],
                preferred_element_type=jnp.float32) + b4_ref[...]

    e = jnp.exp(-y)  # EUP slot; overflow to +inf still gives sigmoid->0 correctly.
    if approx_sigmoid:
        o_ref[...] = pl.reciprocal(1.0 + e, approx=True).astype(o_ref.dtype)
    else:
        o_ref[...] = (1.0 / (1.0 + e)).astype(o_ref.dtype)


def init_params(key, input_size):
    """nn.Linear-style U(-1/sqrt(fan_in), 1/sqrt(fan_in)) init, weights as (in, out)."""
    dims = [(input_size, 64), (64, 32), (32, 64), (64, input_size)]
    params = {}
    for idx, (fan_in, fan_out) in enumerate(dims, start=1):
        key, kw, kb = jax.random.split(key, 3)
        bound = 1.0 / jnp.sqrt(float(fan_in))
        params[f"w{idx}"] = jax.random.uniform(
            kw, (fan_in, fan_out), jnp.float32, -bound, bound)
        params[f"b{idx}"] = jax.random.uniform(
            kb, (1, fan_out), jnp.float32, -bound, bound)
    return params


def pad_params(params, compute_dtype=jnp.float32):
    """Zero-pad hidden widths up to 128 lanes; cast weights to `compute_dtype`.

    Padded weight columns / bias entries are zero, so padded hidden units are
    ReLU(0) = 0 and contribute nothing downstream: numerics are unchanged.
    Biases stay float32 (added after the f32 accumulation).
    """
    w1, w2, w3, w4 = params["w1"], params["w2"], params["w3"], params["w4"]
    b1, b2, b3, b4 = params["b1"], params["b2"], params["b3"], params["b4"]
    D = w1.shape[0]
    h1 = _round_up(w1.shape[1], _LANE)   # 64  -> 128
    h2 = _round_up(w2.shape[1], _LANE)   # 32  -> 128

    def pad(a, shape):
        out = jnp.zeros(shape, a.dtype)
        return out.at[tuple(slice(0, s) for s in a.shape)].set(a)

    padded = {
        "w1": pad(w1, (D, h1)),  "b1": pad(b1, (1, h1)),
        "w2": pad(w2, (h1, h2)), "b2": pad(b2, (1, h2)),
        "w3": pad(w3, (h2, h1)), "b3": pad(b3, (1, h1)),
        "w4": pad(w4, (h1, D)),  "b4": pad(b4, (1, D)),
    }
    for k in ("w1", "w2", "w3", "w4"):
        padded[k] = padded[k].astype(compute_dtype)
    return padded


def autoencoder_forward(x, padded_params, *, batch_tile=512, approx_sigmoid=False):
    """x: (B, D) float32.  padded_params: output of pad_params()."""
    B, D = x.shape
    out_dtype = x.dtype
    p = padded_params
    compute_dtype = p["w1"].dtype

    # Pick the batch tile: multiple of 16 (bf16-friendly sublane packing),
    # large enough to fill the MXU and amortize per-step overhead, but keep
    # grid >= 2 when B allows so both v7x TensorCores get work.
    base = 16
    pb = _round_up(B, base)
    tile = min(_round_up(batch_tile, base),
               max(base, _round_up(pl.cdiv(pb, 2), base)))
    Bp = _round_up(B, tile)
    grid = Bp // tile

    xc = x.astype(compute_dtype)
    if Bp != B:
        xc = jnp.pad(xc, ((0, Bp - B), (0, 0)))  # host-side pad; sliced off below

    def rep(a):  # weights/biases: constant block index -> DMA'd once, VMEM-resident
        return pl.BlockSpec(a.shape, lambda i: (0, 0))

    kernel = functools.partial(autoencoder_kernel, approx_sigmoid=approx_sigmoid)

    grid_spec = pltpu.PrefetchScalarGridSpec(
        num_scalar_prefetch=0,
        grid=(grid,),
        in_specs=[
            pl.BlockSpec((tile, D), lambda i: (i, 0)),   # x: streamed per step
            rep(p["w1"]), rep(p["b1"]),
            rep(p["w2"]), rep(p["b2"]),
            rep(p["w3"]), rep(p["b3"]),
            rep(p["w4"]), rep(p["b4"]),
        ],
        out_specs=pl.BlockSpec((tile, D), lambda i: (i, 0)),
    )

    out = pl.pallas_call(
        kernel,
        out_shape=jax.ShapeDtypeStruct((Bp, D), out_dtype),
        grid_spec=grid_spec,
        compiler_params=pltpu.CompilerParams(
            dimension_semantics=("parallel",)),
    )(xc, p["w1"], p["b1"], p["w2"], p["b2"], p["w3"], p["b3"], p["w4"], p["b4"])

    return out[:B] if Bp != B else out


def reference_forward(x, params):
    h = jnp.maximum(x @ params["w1"] + params["b1"], 0.0)
    h = jnp.maximum(h @ params["w2"] + params["b2"], 0.0)
    h = jnp.maximum(h @ params["w3"] + params["b3"], 0.0)
    y = h @ params["w4"] + params["b4"]
    return jax.nn.sigmoid(y)


if __name__ == "__main__":
    input_size = 128   # lane-aligned feature dim (arbitrary D also supported)
    batch = 100        # deliberately not a multiple of the tile -> exercises host pad

    key = jax.random.PRNGKey(0)
    key, kx = jax.random.split(key)
    x = jax.random.normal(kx, (batch, input_size), jnp.float32)
    params = init_params(key, input_size)
    ref = reference_forward(x, params)

    # Exact f32 path (tight tolerance vs the pure-JAX reference).
    p_f32 = pad_params(params, jnp.float32)
    out_f32 = jax.block_until_ready(autoencoder_forward(x, p_f32))
    assert out_f32.shape == (batch, input_size)
    assert jnp.allclose(out_f32, ref, atol=1e-5, rtol=1e-5), "f32 mismatch vs reference"

    # bf16 MXU-operand fast path (v5e/v6e/v7x) with approx-reciprocal sigmoid.
    p_bf16 = pad_params(params, jnp.bfloat16)
    out_bf16 = jax.block_until_ready(
        autoencoder_forward(x, p_bf16, approx_sigmoid=True))
    assert out_bf16.shape == (batch, input_size)
    assert jnp.allclose(out_bf16, ref, atol=5e-2, rtol=0.0), "bf16 mismatch vs reference"

    print("KERNEL_OK")
</pallas_src>

<mosaic_0001>
module attributes {stable_mosaic.version = 11 : i64} {
  func.func @autoencoder_kernel(%arg0: i32, %arg1: memref<64x128xf32, #tpu.memory_space<vmem>>, %arg2: memref<128x128xf32, #tpu.memory_space<vmem>>, %arg3: memref<1x128xf32, #tpu.memory_space<vmem>>, %arg4: memref<128x128xf32, #tpu.memory_space<vmem>>, %arg5: memref<1x128xf32, #tpu.memory_space<vmem>>, %arg6: memref<128x128xf32, #tpu.memory_space<vmem>>, %arg7: memref<1x128xf32, #tpu.memory_space<vmem>>, %arg8: memref<128x128xf32, #tpu.memory_space<vmem>>, %arg9: memref<1x128xf32, #tpu.memory_space<vmem>>, %arg10: memref<64x128xf32, #tpu.memory_space<vmem>>) attributes {dimension_semantics = [#tpu.dimension_semantics<parallel>], iteration_bounds = array<i64: 2>, scalar_prefetch = 0 : i64, scratch_operands = 0 : i64, tpu.core_type = #tpu.core_type<tc>, window_params = [{transform_indices = @transform_0, window_bounds = array<i64: 64, 128>}, {pipeline_mode = #tpu.pipeline_mode<synchronous>, transform_indices = @transform_1, window_bounds = array<i64: 128, 128>}, {pipeline_mode = #tpu.pipeline_mode<synchronous>, transform_indices = @transform_2, window_bounds = array<i64: 1, 128>}, {pipeline_mode = #tpu.pipeline_mode<synchronous>, transform_indices = @transform_3, window_bounds = array<i64: 128, 128>}, {pipeline_mode = #tpu.pipeline_mode<synchronous>, transform_indices = @transform_4, window_bounds = array<i64: 1, 128>}, {pipeline_mode = #tpu.pipeline_mode<synchronous>, transform_indices = @transform_5, window_bounds = array<i64: 128, 128>}, {pipeline_mode = #tpu.pipeline_mode<synchronous>, transform_indices = @transform_6, window_bounds = array<i64: 1, 128>}, {pipeline_mode = #tpu.pipeline_mode<synchronous>, transform_indices = @transform_7, window_bounds = array<i64: 128, 128>}, {pipeline_mode = #tpu.pipeline_mode<synchronous>, transform_indices = @transform_8, window_bounds = array<i64: 1, 128>}, {transform_indices = @transform_9, window_bounds = array<i64: 64, 128>}]} {
    %c0 = arith.constant 0 : index
    %c0_0 = arith.constant 0 : index
    %0 = vector.load %arg1[%c0, %c0_0] : memref<64x128xf32, #tpu.memory_space<vmem>>, vector<64x128xf32>
    %c0_1 = arith.constant 0 : index
    %c0_2 = arith.constant 0 : index
    %1 = vector.load %arg2[%c0_1, %c0_2] : memref<128x128xf32, #tpu.memory_space<vmem>>, vector<128x128xf32>
    %cst = arith.constant dense<0.000000e+00> : vector<64x128xf32>
    %2 = tpu.matmul %0, %1, %cst {dimension_numbers = #tpu.dot_dimension_numbers<[1], [0], [0], [1], [0, 0, 1, 1], [], []>} : vector<64x128xf32>, vector<128x128xf32>, vector<64x128xf32> -> vector<64x128xf32>
    %c0_3 = arith.constant 0 : index
    %c0_4 = arith.constant 0 : index
    %3 = vector.load %arg3[%c0_3, %c0_4] : memref<1x128xf32, #tpu.memory_space<vmem>>, vector<1x128xf32>
    %4 = vector.broadcast %3 : vector<1x128xf32> to vector<64x128xf32>
    %5 = arith.addf %2, %4 : vector<64x128xf32>
    %cst_5 = arith.constant 0.000000e+00 : f32
    %6 = vector.broadcast %cst_5 : f32 to vector<64x128xf32>
    %7 = arith.maximumf %5, %6 : vector<64x128xf32>
    %c0_6 = arith.constant 0 : index
    %c0_7 = arith.constant 0 : index
    %8 = vector.load %arg4[%c0_6, %c0_7] : memref<128x128xf32, #tpu.memory_space<vmem>>, vector<128x128xf32>
    %cst_8 = arith.constant dense<0.000000e+00> : vector<64x128xf32>
    %9 = tpu.matmul %7, %8, %cst_8 {dimension_numbers = #tpu.dot_dimension_numbers<[1], [0], [0], [1], [0, 0, 1, 1], [], []>} : vector<64x128xf32>, vector<128x128xf32>, vector<64x128xf32> -> vector<64x128xf32>
    %c0_9 = arith.constant 0 : index
    %c0_10 = arith.constant 0 : index
    %10 = vector.load %arg5[%c0_9, %c0_10] : memref<1x128xf32, #tpu.memory_space<vmem>>, vector<1x128xf32>
    %11 = vector.broadcast %10 : vector<1x128xf32> to vector<64x128xf32>
    %12 = arith.addf %9, %11 : vector<64x128xf32>
    %cst_11 = arith.constant 0.000000e+00 : f32
    %13 = vector.broadcast %cst_11 : f32 to vector<64x128xf32>
    %14 = arith.maximumf %12, %13 : vector<64x128xf32>
    %c0_12 = arith.constant 0 : index
    %c0_13 = arith.constant 0 : index
    %15 = vector.load %arg6[%c0_12, %c0_13] : memref<128x128xf32, #tpu.memory_space<vmem>>, vector<128x128xf32>
    %cst_14 = arith.constant dense<0.000000e+00> : vector<64x128xf32>
    %16 = tpu.matmul %14, %15, %cst_14 {dimension_numbers = #tpu.dot_dimension_numbers<[1], [0], [0], [1], [0, 0, 1, 1], [], []>} : vector<64x128xf32>, vector<128x128xf32>, vector<64x128xf32> -> vector<64x128xf32>
    %c0_15 = arith.constant 0 : index
    %c0_16 = arith.constant 0 : index
    %17 = vector.load %arg7[%c0_15, %c0_16] : memref<1x128xf32, #tpu.memory_space<vmem>>, vector<1x128xf32>
    %18 = vector.broadcast %17 : vector<1x128xf32> to vector<64x128xf32>
    %19 = arith.addf %16, %18 : vector<64x128xf32>
    %cst_17 = arith.constant 0.000000e+00 : f32
    %20 = vector.broadcast %cst_17 : f32 to vector<64x128xf32>
    %21 = arith.maximumf %19, %20 : vector<64x128xf32>
    %c0_18 = arith.constant 0 : index
    %c0_19 = arith.constant 0 : index
    %22 = vector.load %arg8[%c0_18, %c0_19] : memref<128x128xf32, #tpu.memory_space<vmem>>, vector<128x128xf32>
    %cst_20 = arith.constant dense<0.000000e+00> : vector<64x128xf32>
    %23 = tpu.matmul %21, %22, %cst_20 {dimension_numbers = #tpu.dot_dimension_numbers<[1], [0], [0], [1], [0, 0, 1, 1], [], []>} : vector<64x128xf32>, vector<128x128xf32>, vector<64x128xf32> -> vector<64x128xf32>
    %c0_21 = arith.constant 0 : index
    %c0_22 = arith.constant 0 : index
    %24 = vector.load %arg9[%c0_21, %c0_22] : memref<1x128xf32, #tpu.memory_space<vmem>>, vector<1x128xf32>
    %25 = vector.broadcast %24 : vector<1x128xf32> to vector<64x128xf32>
    %26 = arith.addf %23, %25 : vector<64x128xf32>
    %cst_23 = arith.constant 0.000000e+00 : f32
    %27 = vector.broadcast %cst_23 : f32 to vector<64x128xf32>
    %28 = arith.subf %27, %26 : vector<64x128xf32>
    %29 = math.exp %28 : vector<64x128xf32>
    %cst_24 = arith.constant 1.000000e+00 : f32
    %30 = vector.broadcast %cst_24 : f32 to vector<64x128xf32>
    %31 = arith.addf %30, %29 : vector<64x128xf32>
    %cst_25 = arith.constant 1.000000e+00 : f32
    %32 = vector.broadcast %cst_25 : f32 to vector<64x128xf32>
    %33 = arith.divf %32, %31 : vector<64x128xf32>
    %c0_26 = arith.constant 0 : index
    %c0_27 = arith.constant 0 : index
    %34 = vector.load %arg10[%c0_26, %c0_27] : memref<64x128xf32, #tpu.memory_space<vmem>>, vector<64x128xf32>
    tpu.vector_store %arg10[%c0_26, %c0_27], %33 {strides = array<i32>} : memref<64x128xf32, #tpu.memory_space<vmem>>, vector<64x128xf32>,
    return
  }
  func.func @transform_0(%arg0: i32) -> (i32, i32) {
    %c0_i32 = arith.constant 0 : i32
    %c0_i32_0 = arith.constant 0 : i32
    return %arg0, %c0_i32 : i32, i32
  }
  func.func @transform_1(%arg0: i32) -> (i32, i32) {
    %c0_i32 = arith.constant 0 : i32
    %c0_i32_0 = arith.constant 0 : i32
    %c0_i32_1 = arith.constant 0 : i32
    return %c0_i32, %c0_i32_0 : i32, i32
  }
  func.func @transform_2(%arg0: i32) -> (i32, i32) {
    %c0_i32 = arith.constant 0 : i32
    %c0_i32_0 = arith.constant 0 : i32
    %c0_i32_1 = arith.constant 0 : i32
    return %c0_i32, %c0_i32_0 : i32, i32
  }
  func.func @transform_3(%arg0: i32) -> (i32, i32) {
    %c0_i32 = arith.constant 0 : i32
    %c0_i32_0 = arith.constant 0 : i32
    %c0_i32_1 = arith.constant 0 : i32
    return %c0_i32, %c0_i32_0 : i32, i32
  }
  func.func @transform_4(%arg0: i32) -> (i32, i32) {
    %c0_i32 = arith.constant 0 : i32
    %c0_i32_0 = arith.constant 0 : i32
    %c0_i32_1 = arith.constant 0 : i32
    return %c0_i32, %c0_i32_0 : i32, i32
  }
  func.func @transform_5(%arg0: i32) -> (i32, i32) {
    %c0_i32 = arith.constant 0 : i32
    %c0_i32_0 = arith.constant 0 : i32
    %c0_i32_1 = arith.constant 0 : i32
    return %c0_i32, %c0_i32_0 : i32, i32
  }
  func.func @transform_6(%arg0: i32) -> (i32, i32) {
    %c0_i32 = arith.constant 0 : i32
    %c0_i32_0 = arith.constant 0 : i32
    %c0_i32_1 = arith.constant 0 : i32
    return %c0_i32, %c0_i32_0 : i32, i32
  }
  func.func @transform_7(%arg0: i32) -> (i32, i32) {
    %c0_i32 = arith.constant 0 : i32
    %c0_i32_0 = arith.constant 0 : i32
    %c0_i32_1 = arith.constant 0 : i32
    return %c0_i32, %c0_i32_0 : i32, i32
  }
  func.func @transform_8(%arg0: i32) -> (i32, i32) {
    %c0_i32 = arith.constant 0 : i32
    %c0_i32_0 = arith.constant 0 : i32
    %c0_i32_1 = arith.constant 0 : i32
    return %c0_i32, %c0_i32_0 : i32, i32
  }
  func.func @transform_9(%arg0: i32) -> (i32, i32) {
    %c0_i32 = arith.constant 0 : i32
    %c0_i32_0 = arith.constant 0 : i32
    return %arg0, %c0_i32 : i32, i32
  }
}

</mosaic_0001>

<bundles_post_ra>
// kernel: tpu_custom_call.1
= control target key start
LH: loop header
LB: loop body
LE: loop exit
PB: predicated region body
PF: predicated region fallthrough
CT: control target
= control target key end

     0   :  { %s1644_s0 = inlined_call_operand.hbm [shape: f32[128,128], index: 0, kind: input, shape index: {}]   ;;  %s1645_s1 = inlined_call_operand.hbm [shape: f32[128,128], index: 1, kind: input, shape index: {}]   ;;  %s1646_s2 = inlined_call_operand.vmem [shape: f32[1,128], index: 2, kind: input, shape index: {}]   ;;  %s1647_s3 = inlined_call_operand.hbm [shape: f32[128,128], index: 3, kind: input, shape index: {}]   ;;  %s1648_s4 = inlined_call_operand.vmem [shape: f32[1,128], index: 4, kind: input, shape index: {}]   ;;  %s1649_s5 = inlined_call_operand.hbm [shape: f32[128,128], index: 5, kind: input, shape index: {}]   ;;  %s1650_s6 = inlined_call_operand.vmem [shape: f32[1,128], index: 6, kind: input, shape index: {}]   ;;  %s1651_s7 = inlined_call_operand.hbm [shape: f32[128,128], index: 7, kind: input, shape index: {}]   ;;  %s1652_s8 = inlined_call_operand.vmem [shape: f32[1,128], index: 8, kind: input, shape index: {}]   ;;  %s1653_s9 = inlined_call_operand.hbm [shape: f32[128,128], index: 9, kind: output, shape index: {}]  }
   0x1   :  { %1656 = sst [smem:[#allocation16_spill]] %s1645_s1 }
   0x2   :  { %1657 = sst [smem:[#allocation17_spill]] %s1647_s3 }
   0x3   :  { %1658 = sst [smem:[#allocation18_spill]] %s1649_s5 }
   0x4   :  { %14 = vsyncpa [#allocation3], 0 }
   0x5   :  { %16 = vsyncpa [#allocation3 + $0x1], 0 }
   0x6   :  { %17 = vsyncpa [#allocation6], 0 }
   0x7   :  { %18 = vsyncpa [#allocation9], 0 }
   0x8   :  { %19 = vsyncpa [#allocation4], 0 }
   0x9   :  { %21 = vsyncpa [#allocation4 + $0x1], 0  ;;  %s1419_s30 = smov 0   ;;  %s1421_s10 = smov 0  }
   0xa   :  { %s1423_s11 = smov 0   ;;  %s1425_s12 = smov 0  }
   0xb LB: > { %s1440_s13 = sadd.s32 4294967295, %s1359_s12   ;;  %s984_s14 = sadd.s32 4294967294, %s1359_s12   ;;  %s1359_s12 = sphi %s1425_s12, %s1674_s12   ;;  %s1355_s11 = sphi %s1423_s11, %s1673_s11   ;;  %s1351_s10 = sphi %s1421_s10, %s1672_s10   ;;  %s1347_s30 = sphi %s1419_s30, %s1671_s30  }
   0xc   : > { %p47_p0 = scmp.ne.s32.totalorder %s1351_s10, %s1347_s30  ;;  %p48_p1 = scmp.eq.s32.totalorder %s1440_s13, 0 }
   0xd   : > { %p239_p2 = scmp.eq.s32.totalorder %s1440_s13, 1  ;;  %p245_p3 = scmp.eq.s32.totalorder %s984_s14, 1 }
   0xe   : > { %p1449_p4 = por %p48_p1, %p47_p0  ;;  %p985_p5 = scmp.ge.s32.totalorder %s1359_s12, 1 }
   0xf   : > { %p1454_p6 = por %p245_p3, %p47_p0  ;;  %p252_p7 = scmp.lt.s32.totalorder %s1359_s12, 3 }
  0x10   : > { %s1661_s1 = sld [smem:[#allocation16_spill]]  ;;  %s1361_s21 = smov [#allocation5]  }
  0x11   : > { %p1462_p8 = pnand %p985_p5, %p252_p7  ;;  %s265_s22 = sshll.u32 %s1361_s21, 4  ;;  %s266_s22 = int_to_ptr.vmem [resolvable:$true] %s265_s22 }
  0x12   : > { %s1664_s5 = sld [smem:[#allocation18_spill]]  ;;  %s1654_s27 = smov 128  }
  0x13   : > { %p1028_p9 = pneg %p1462_p8  ;;  %s1655_s28 = smov 8  }
  0x14   : > { %s1364_s29 = smov [#allocation8]   ;;  %s1665_s3 = sld [smem:[#allocation17_spill]] }
  0x15   : > { %p1470_p10 = pnand %p1028_p9, %p48_p1  ;;  %s299_s14 = sshll.u32 %s1364_s29, 4  ;;  %s300_s14 = int_to_ptr.vmem [resolvable:$true] %s299_s14 }
  0x16   : > { %s263_s19 = sshll.u32 %s1661_s1, 4  ;;  %s314_s24 = sshll.u32 %s1651_s7, 4  ;;  %s264_s19 = int_to_ptr.hbm [resolvable:$true] %s263_s19  ;;  %s315_s24 = int_to_ptr.hbm [resolvable:$true] %s314_s24 }
  0x17   : > { %1031 = dma.hbm_to_vmem [thread:$0]  (!%p1470_p10), %s264_s19, 2048, %s266_s22, [#allocation6], %s1654_s27, %s1654_s27, %s1655_s28  }
  0x18   : > { %s297_s26 = sshll.u32 %s1664_s5, 4  ;;  %s1365_s25 = smov [#allocation7]   ;;  %s298_s26 = int_to_ptr.hbm [resolvable:$true] %s297_s26 }
  0x19   : > { %1037 = dma.hbm_to_vmem [thread:$0]  (!%p1470_p10), %s298_s26, 2048, %s300_s14, [#allocation9], %s1654_s27, %s1654_s27, %s1655_s28  }
  0x1a   : > { %s280_s21 = sshll.u32 %s1665_s3, 4  ;;  %s282_s29 = sshll.u32 %s1365_s25, 4  ;;  %s281_s21 = int_to_ptr.hbm [resolvable:$true] %s280_s21  ;;  %s283_s29 = int_to_ptr.vmem [resolvable:$true] %s282_s29 }
  0x1b   : > { %1034 = dma.hbm_to_vmem [thread:$0]  (!%p1470_p10), %s281_s21, 2048, %s283_s29, [#allocation6], %s1654_s27, %s1654_s27, %s1655_s28  }
  0x1c   : > { %s1366_s17 = smov [#allocation10]   ;;  %s1505_s14 = sadd.s32 1, %s1359_s12  }
  0x1d   : > { %s316_s26 = sshll.u32 %s1366_s17, 4  ;;  %s34_s18 = sadd.s32 1, %s1355_s11  ;;  %s317_s26 = int_to_ptr.vmem [resolvable:$true] %s316_s26 }
  0x1e   : > { %1040 = dma.hbm_to_vmem [thread:$0]  (!%p1470_p10), %s315_s24, 2048, %s317_s26, [#allocation9], %s1654_s27, %s1654_s27, %s1655_s28  }
  0x1f   : > { %s31_s19 = ssub.s32 %s1359_s12, %s1505_s14  ;;  %p41_p12 = scmp.ne.s32.totalorder %s1355_s11, %s1351_s10 }
  0x20   : > { %p32_p13 = scmp.eq.s32.totalorder %s31_s19, 0  ;;  %p42_p0 = scmp.eq.s32.totalorder %s1359_s12, 0 }
  0x21   : > { %p1515_p3 = por %p239_p2, %p41_p12  ;;  %p1053_p5 = scmp.lt.s32.totalorder %s1359_s12, 2 }
  0x22   : > { %s1521_s22 = scalar_select %p32_p13, %s1355_s11, %s34_s18  }
  0x23   : > { %p43_p7 = por %p42_p0, %p41_p12  ;;  %s333_s23 = sand.u32 1, %s1355_s11  }
  0x24   : > { %s991_s25 = sshll.u32 %s333_s23, 6  ;;  %s1006_s24 = sshll.u32 %s1359_s12, 6 }
  0x25   : > { %s342_s26 = scalar_lea.hbm %s1644_s0, %s1006_s24  ;;  %s337_s27 = scalar_lea.vmem [#allocation2], %s991_s25 }
  0x26   : > { %s345_s28 = sshll.u32 %s337_s27, 4  ;;  %s343_s19 = sshll.u32 %s342_s26, 4  ;;  %s346_s28 = int_to_ptr.vmem [resolvable:$true] %s345_s28  ;;  %s344_s19 = int_to_ptr.hbm [resolvable:$true] %s343_s19 }
  0x27   : > { %p1528_p2 = pnand %p1053_p5, %p43_p7  ;;  %s334_s18 = scalar_lea.sflag [#allocation3], %s333_s23 }
  0x28   : > { %s1255_s3 = sshra.s32 %s344_s19, 4  ;;  %s1262_s27 = scalar_lea.hbm %s1644_s0, 128  ;;  %s1256_s3 = int_to_ptr.hbm [resolvable:$true] %s1255_s3 }
  0x29   : > { %s1257_s5 = scalar_lea.hbm %s1256_s3, 64  ;;  %p1259_p10 = pneg %p1528_p2 }
  0x2a   : > { %p1258_p9 = scmp.ne.s32.totalorder %s1256_s3, %s1257_s5  ;;  %p1263_p0 = scmp.lt.s32.totalorder %s1256_s3, %s1644_s0 }
  0x2b   : > { %p1264_p5 = scmp.lt.s32.totalorder %s1262_s27, %s1257_s5 }
  0x2c   : > { %p1260_p12 = pnand %p1259_p10, %p1258_p9 }
  0x2d   : > { %p1265_p7 = por %p1264_p5, %p1263_p0 }
  0x2e   : > { %p1261_p13 = pneg %p1260_p12 }
  0x30   : > { %p1266_p11 = pnand %p1265_p7, %p1261_p13 }
  0x32   : > { %1269 = shalt.err (!%p1266_p11)
}
  0x33   : > { %s1668_s23 = smov 8   ;;  %s1669_s26 = smov 128  }
  0x34   : > { %1044 = dma.hbm_to_vmem [thread:$0]  (!%p1528_p2), %s344_s19, 1024, %s346_s28, %s334_s18, %s1669_s26, %s1669_s26, %s1668_s23  }
  0x35   : > { %357 = sbr.rel (%p1462_p8) target bundleno = 715 (0x2cb), region = 56  ;;  %s1548_s24 = sand.u32 (!%p1462_p8), 1, %s1351_s10  }
  0x36   : > { %s995_s3 = sshll.u32 (!%p1462_p8), %s1548_s24, 6  ;;  %s360_s5 = scalar_lea.sflag (!%p1462_p8), [#allocation3], %s1548_s24 }
  0x37   : > { %s1554_s25 = scalar_lea.vmem (!%p1462_p8), [#allocation2], %s995_s3 }
  0x3a   : > { %1330 = dma.done.wait (%p1449_p4), %s360_s5, 1024  }
  0x3b   : > { %1332 = vsyncadd (%p1449_p4), %s360_s5, 4294966272 }
  0x3c   : > { %1334 = dma.done.wait (%p48_p1), [#allocation6], 4096  }
  0x3d   : > { %1336 = vsyncadd (%p48_p1), [#allocation6], 4294963200 }
  0x3e   : > { %1338 = dma.done.wait (%p48_p1), [#allocation9], 4096  }
  0x3f   : > { %1340 = vsyncadd (%p48_p1), [#allocation9], 4294963200  ;;  %v444_v0 = vld [vmem:[#allocation5 + $0x78] sm:$0xff]  ;;  %v443_v1 = vld [vmem:[#allocation5 + $0x70] sm:$0xff]  ;;  %s1596_s17 = scalar_lea.vmem [#allocation11], %s995_s3  ;;  %s1007_s23 = sshll.u32 %s1440_s13, 6 }
  0x40   : > { %449 = vmatpush.msra.mxu0 %v444_v0  ;;  %v442_v2 = vld [vmem:[#allocation5 + $0x68] sm:$0xff]  ;;  %v441_v3 = vld [vmem:[#allocation5 + $0x60] sm:$0xff]  ;;  %v440_v4 = vld [vmem:[#allocation5 + $0x58] sm:$0xff]  ;;  %s869_s5 = scalar_lea.hbm %s1653_s9, %s1007_s23  ;;  %s870_s13 = sshll.u32 %s1596_s17, 4  ;;  %s871_s13 = int_to_ptr.vmem [resolvable:$true] %s870_s13 }
  0x41   : > { %v439_v5 = vld [vmem:[#allocation5 + $0x50] sm:$0xff]  ;;  %v438_v6 = vld [vmem:[#allocation5 + $0x48] sm:$0xff]  ;;  %v437_v7 = vld [vmem:[#allocation5 + $0x40] sm:$0xff]  ;;  %s858_s1 = scalar_lea.sflag [#allocation4], %s1548_s24  ;;  %s1305_s18 = scalar_lea.hbm %s1653_s9, 128 }
  0x42   : > { %450 = vmatpush.msra.mxu0 %v443_v1  ;;  %v436_v8 = vld [vmem:[#allocation5 + $0x38] sm:$0xff]  ;;  %v435_v9 = vld [vmem:[#allocation5 + $0x30] sm:$0xff]  ;;  %v434_v10 = vld [vmem:[#allocation5 + $0x28] sm:$0xff] }
  0x43   : > { %v433_v11 = vld [vmem:[#allocation5 + $0x20] sm:$0xff]  ;;  %v432_v12 = vld [vmem:[#allocation5 + $0x18] sm:$0xff]  ;;  %v431_v13 = vld [vmem:[#allocation5 + $0x10] sm:$0xff] }
  0x44   : > { %451 = vmatpush.msra.mxu0 %v442_v2  ;;  %v430_v14 = vld [vmem:[#allocation5 + $0x8] sm:$0xff]  ;;  %v429_v15 = vld [vmem:[#allocation5] sm:$0xff]  ;;  %v423_v18 = vld [vmem:[%s1554_s25 + $0x10] sm:$0xff] }
  0x45   : > { %v421_v16 = vld [vmem:[%s1554_s25] sm:$0xff]  ;;  %v422_v17 = vld [vmem:[%s1554_s25 + $0x8] sm:$0xff]  ;;  %v424_v19 = vld [vmem:[%s1554_s25 + $0x18] sm:$0xff] }
  0x46   : > { %452 = vmatpush.msra.mxu0 %v441_v3  ;;  %v513_v20 = vld [vmem:[#allocation7 + $0x78] sm:$0xff]  ;;  %v512_v21 = vld [vmem:[#allocation7 + $0x70] sm:$0xff]  ;;  %v511_v22 = vld [vmem:[#allocation7 + $0x68] sm:$0xff] }
  0x47   : > { %518 = vmatpush.msra.mxu1 %v513_v20  ;;  %v510_v23 = vld [vmem:[#allocation7 + $0x60] sm:$0xff]  ;;  %v509_v25 = vld [vmem:[#allocation7 + $0x58] sm:$0xff]  ;;  %v508_v26 = vld [vmem:[#allocation7 + $0x50] sm:$0xff] }
  0x48   : > { %453 = vmatpush.msra.mxu0 %v440_v4  ;;  %v425_v24 = vld [vmem:[%s1554_s25 + $0x20] sm:$0xff]  ;;  %v507_v27 = vld [vmem:[#allocation7 + $0x48] sm:$0xff]  ;;  %v505_v30 = vld [vmem:[#allocation7 + $0x38] sm:$0xff] }
  0x49   : > { %519 = vmatpush.msra.mxu1 %v512_v21  ;;  %v506_v28 = vld [vmem:[#allocation7 + $0x40] sm:$0xff]  ;;  %v426_v29 = vld [vmem:[%s1554_s25 + $0x28] sm:$0xff]  ;;  %v504_v31 = vld [vmem:[#allocation7 + $0x30] sm:$0xff] }
  0x4a   : > { %454 = vmatpush.msra.mxu0 %v439_v5  ;;  %v503_v32 = vld [vmem:[#allocation7 + $0x28] sm:$0xff]  ;;  %v502_v33 = vld [vmem:[#allocation7 + $0x20] sm:$0xff]  ;;  %v427_v34 = vld [vmem:[%s1554_s25 + $0x30] sm:$0xff] }
  0x4b   : > { %520 = vmatpush.msra.mxu1 %v511_v22  ;;  %v501_v35 = vld [vmem:[#allocation7 + $0x18] sm:$0xff]  ;;  %v500_v37 = vld [vmem:[#allocation7 + $0x10] sm:$0xff]  ;;  %v499_v38 = vld [vmem:[#allocation7 + $0x8] sm:$0xff] }
  0x4c   : > { %455 = vmatpush.msra.mxu0 %v438_v6  ;;  %v428_v36 = vld [vmem:[%s1554_s25 + $0x38] sm:$0xff]  ;;  %v498_v39 = vld [vmem:[#allocation7] sm:$0xff]  ;;  %v581_v54 = vld [vmem:[#allocation8 + $0x70] sm:$0xff]  ;;  %s872_s25 = sshll.u32 %s869_s5, 4  ;;  %s873_s25 = int_to_ptr.hbm [resolvable:$true] %s872_s25 }
  0x4d   : > { %521 = vmatpush.msra.mxu1 %v510_v23  ;;  %v1099_v40 = vld [vmem:[%s1646_s2] ss:$0 sm:$0xff]  ;;  %v582_v53 = vld [vmem:[#allocation8 + $0x78] sm:$0xff]  ;;  %v580_v55 = vld [vmem:[#allocation8 + $0x68] sm:$0xff]  ;;  %s1299_s15 = sshra.s32 %s873_s25, 4  ;;  %s1300_s15 = int_to_ptr.hbm [resolvable:$true] %s1299_s15 }
  0x4e   : > { %456 = vmatpush.msra.mxu0 %v437_v7  ;;  %587 = vmatpush.msra.mxu2 %v582_v53  ;;  %v579_v58 = vld [vmem:[#allocation8 + $0x60] sm:$0xff]  ;;  %v578_v60 = vld [vmem:[#allocation8 + $0x58] sm:$0xff]  ;;  %v577_v61 = vld [vmem:[#allocation8 + $0x50] sm:$0xff]  ;;  %s1301_s20 = scalar_lea.hbm %s1300_s15, 64  ;;  %p1306_p11 = scmp.lt.s32.totalorder %s1300_s15, %s1653_s9 }
  0x4f   : > { %522 = vmatpush.msra.mxu1 %v509_v25  ;;  %v576_v62 = vld [vmem:[#allocation8 + $0x48] sm:$0xff]  ;;  %v575_v1 = vld [vmem:[#allocation8 + $0x40] sm:$0xff]  ;;  %v574_v3 = vld [vmem:[#allocation8 + $0x38] sm:$0xff]  ;;  %p1302_p1 = scmp.ne.s32.totalorder %s1300_s15, %s1301_s20  ;;  %p1307_p2 = scmp.lt.s32.totalorder %s1305_s18, %s1301_s20 }
  0x50   : > { %457 = vmatpush.msra.mxu0 %v436_v8  ;;  %588 = vmatpush.msra.mxu2 %v581_v54  ;;  %v573_v4 = vld [vmem:[#allocation8 + $0x30] sm:$0xff]  ;;  %v572_v5 = vld [vmem:[#allocation8 + $0x28] sm:$0xff]  ;;  %v571_v8 = vld [vmem:[#allocation8 + $0x20] sm:$0xff] }
  0x51   : > { %523 = vmatpush.msra.mxu1 %v508_v26  ;;  %p1303_p4 = pnand %p1302_p1, %p1515_p3  ;;  %p1308_p9 = por %p1307_p2, %p1306_p11 }
  0x52   : > { %458 = vmatpush.msra.mxu0 %v435_v9  ;;  %589 = vmatpush.msra.mxu2 %v580_v55  ;;  %v638_v55 = vld [vmem:[#allocation10 + $0x10] sm:$0xff] }
  0x53   : > { %524 = vmatpush.msra.mxu1 %v507_v27  ;;  %p1304_p8 = pneg %p1303_p4 }
  0x54   : > { %459 = vmatpush.msra.mxu0 %v434_v10  ;;  %590 = vmatpush.msra.mxu2 %v579_v58  ;;  %v570_v10 = vld [vmem:[#allocation8 + $0x18] sm:$0xff]  ;;  %v1101_v58 = vld [vmem:[%s1650_s6] ss:$0 sm:$0xff] }
  0x55   : > { %525 = vmatpush.msra.mxu1 %v506_v28  ;;  %p1309_p10 = pnand %p1308_p9, %p1304_p8 }
  0x56   : > { %460 = vmatpush.msra.mxu0 %v433_v11  ;;  %591 = vmatpush.msra.mxu2 %v578_v60 }
  0x57   : > { %526 = vmatpush.msra.mxu1 %v505_v30  ;;  %v651_v30 = vld [vmem:[#allocation10 + $0x78] sm:$0xff] }
  0x58   : > { %461 = vmatpush.msra.mxu0 %v432_v12  ;;  %592 = vmatpush.msra.mxu2 %v577_v61 }
  0x59   : > { %527 = vmatpush.msra.mxu1 %v504_v31  ;;  %v650_v31 = vld [vmem:[#allocation10 + $0x70] sm:$0xff]  ;;  %656 = vmatpush.msra.mxu3 %v651_v30 }
  0x5a   : > { %462 = vmatpush.msra.mxu0 %v431_v13  ;;  %593 = vmatpush.msra.mxu2 %v576_v62 }
  0x5b   : > { %528 = vmatpush.msra.mxu1 %v503_v32  ;;  %v649_v32 = vld [vmem:[#allocation10 + $0x68] sm:$0xff]  ;;  %657 = vmatpush.msra.mxu3 %v650_v31 }
  0x5c   : > { %463 = vmatpush.msra.mxu0 %v430_v14  ;;  %594 = vmatpush.msra.mxu2 %v575_v1  ;;  %v569_v14 = vld [vmem:[#allocation8 + $0x10] sm:$0xff] }
  0x5d   : > { %529 = vmatpush.msra.mxu1 %v502_v33  ;;  %658 = vmatpush.msra.mxu3 %v649_v32 }
  0x5e   : > { %464 = vmatpush.msra.mxu0 %v429_v15  ;;  %595 = vmatpush.msra.mxu2 %v574_v3  ;;  %v568_v15 = vld [vmem:[#allocation8 + $0x8] sm:$0xff] }
  0x5f   : > { %465 = vmatmul.f32.vlgmr.msra.gmra.mxu0 %v421_v16  ;;  %530 = vmatpush.msra.mxu1 %v501_v35  ;;  %v567_v16 = vld [vmem:[#allocation8] sm:$0xff] }
  0x60   : > { %596 = vmatpush.msra.mxu2 %v573_v4  ;;  %v648_v35 = vld [vmem:[#allocation10 + $0x60] sm:$0xff] }
  0x61   : > { %531 = vmatpush.msra.mxu1 %v500_v37  ;;  %v647_v37 = vld [vmem:[#allocation10 + $0x58] sm:$0xff]  ;;  %659 = vmatpush.msra.mxu3 %v648_v35 }
  0x62   : > { %597 = vmatpush.msra.mxu2 %v572_v5 }
  0x63   : > { %532 = vmatpush.msra.mxu1 %v499_v38  ;;  %v646_v38 = vld [vmem:[#allocation10 + $0x50] sm:$0xff]  ;;  %660 = vmatpush.msra.mxu3 %v647_v37 }
  0x64   : > { %598 = vmatpush.msra.mxu2 %v571_v8 }
  0x65   : > { %533 = vmatpush.msra.mxu1 %v498_v39  ;;  %v645_v39 = vld [vmem:[#allocation10 + $0x48] sm:$0xff]  ;;  %661 = vmatpush.msra.mxu3 %v646_v38 }
  0x66   : > { %599 = vmatpush.msra.mxu2 %v570_v10 }
  0x67   : > { %468 = vmatmul.f32.gmra.mxu0 %v422_v17  ;;  %v1100_v17 = vld [vmem:[%s1648_s4] ss:$0 sm:$0xff]  ;;  %662 = vmatpush.msra.mxu3 %v645_v39 }
  0x68   : > { %600 = vmatpush.msra.mxu2 %v569_v14 }
  0x6a   : > { %601 = vmatpush.msra.mxu2 %v568_v15 }
  0x6c   : > { %602 = vmatpush.msra.mxu2 %v567_v16 }
  0x6f   : > { %471 = vmatmul.f32.gmra.mxu0 %v423_v18 }
  0x77   : > { %474 = vmatmul.f32.gmra.mxu0 %v424_v19 }
  0x7f   : > { %477 = vmatmul.f32.gmra.mxu0 %v425_v24 }
  0x87   : > { %480 = vmatmul.f32.gmra.mxu0 %v426_v29 }
  0x8f   : > { %483 = vmatmul.f32.gmra.mxu0 %v427_v34 }
  0x97   : > { %486 = vmatmul.f32.gmra.mxu0 %v428_v36 }
  0xdc   : > { %v466_v41 = vpop.f32.mrf.mxu0 }
  0xdd   : > { %v467_v42 = vadd.f32 %v1099_v40, %v466_v41 }
  0xdf   : > { %v490_v43 = vmax.f32 %v467_v42, 0.0  ;;  %v644_v42 = vld [vmem:[#allocation10 + $0x40] sm:$0xff] }
  0xe0   : > { %663 = vmatpush.msra.mxu3 %v644_v42 }
  0xe1   : > { %534 = vmatmul.f32.vlgmr.msra.gmra.mxu1 %v490_v43 }
  0xe4   : > { %v469_v44 = vpop.f32.mrf.mxu0 }
  0xe5   : > { %v470_v45 = vadd.f32 %v1099_v40, %v469_v44  ;;  %v643_v44 = vld [vmem:[#allocation10 + $0x38] sm:$0xff] }
  0xe6   : > { %664 = vmatpush.msra.mxu3 %v643_v44 }
  0xe7   : > { %v491_v46 = vmax.f32 %v470_v45, 0.0  ;;  %v642_v45 = vld [vmem:[#allocation10 + $0x30] sm:$0xff] }
  0xe8   : > { %665 = vmatpush.msra.mxu3 %v642_v45 }
  0xe9   : > { %537 = vmatmul.f32.gmra.mxu1 %v491_v46  ;;  %v641_v46 = vld [vmem:[#allocation10 + $0x28] sm:$0xff] }
  0xea   : > { %666 = vmatpush.msra.mxu3 %v641_v46 }
  0xec   : > { %v472_v47 = vpop.f32.mrf.mxu0 }
  0xed   : > { %v473_v48 = vadd.f32 %v1099_v40, %v472_v47 }
  0xef   : > { %v492_v49 = vmax.f32 %v473_v48, 0.0 }
  0xf1   : > { %540 = vmatmul.f32.gmra.mxu1 %v492_v49  ;;  %v640_v49 = vld [vmem:[#allocation10 + $0x20] sm:$0xff] }
  0xf2   : > { %667 = vmatpush.msra.mxu3 %v640_v49 }
  0xf4   : > { %v475_v50 = vpop.f32.mrf.mxu0 }
  0xf5   : > { %v476_v51 = vadd.f32 %v1099_v40, %v475_v50 }
  0xf7   : > { %v493_v52 = vmax.f32 %v476_v51, 0.0  ;;  %v639_v51 = vld [vmem:[#allocation10 + $0x18] sm:$0xff] }
  0xf8   : > { %668 = vmatpush.msra.mxu3 %v639_v51 }
  0xf9   : > { %543 = vmatmul.f32.gmra.mxu1 %v493_v52 }
  0xfa   : > { %669 = vmatpush.msra.mxu3 %v638_v55 }
  0xfc   : > { %v478_v56 = vpop.f32.mrf.mxu0 }
  0xfd   : > { %v479_v57 = vadd.f32 %v1099_v40, %v478_v56  ;;  %v637_v56 = vld [vmem:[#allocation10 + $0x8] sm:$0xff] }
  0xfe   : > { %670 = vmatpush.msra.mxu3 %v637_v56 }
  0xff   : > { %v494_v59 = vmax.f32 %v479_v57, 0.0  ;;  %v636_v57 = vld [vmem:[#allocation10] sm:$0xff] }
 0x100   : > { %671 = vmatpush.msra.mxu3 %v636_v57 }
 0x101   : > { %546 = vmatmul.f32.gmra.mxu1 %v494_v59 }
 0x104   : > { %v481_v63 = vpop.f32.mrf.mxu0 }
 0x105   : > { %v482_v0 = vadd.f32 %v1099_v40, %v481_v63 }
 0x107   : > { %v495_v2 = vmax.f32 %v482_v0, 0.0 }
 0x109   : > { %549 = vmatmul.f32.gmra.mxu1 %v495_v2 }
 0x10c   : > { %v484_v6 = vpop.f32.mrf.mxu0 }
 0x10d   : > { %v485_v7 = vadd.f32 %v1099_v40, %v484_v6 }
 0x10f   : > { %v496_v9 = vmax.f32 %v485_v7, 0.0 }
 0x111   : > { %552 = vmatmul.f32.gmra.mxu1 %v496_v9 }
 0x114   : > { %v487_v11 = vpop.f32.mrf.mxu0 }
 0x115   : > { %v488_v12 = vadd.f32 %v1099_v40, %v487_v11 }
 0x117   : > { %v497_v13 = vmax.f32 %v488_v12, 0.0 }
 0x119   : > { %555 = vmatmul.f32.gmra.mxu1 %v497_v13 }
 0x15e   : > { %v535_v18 = vpop.f32.mrf.mxu1 }
 0x15f   : > { %v536_v19 = vadd.f32 %v1100_v17, %v535_v18 }
 0x161   : > { %v559_v20 = vmax.f32 %v536_v19, 0.0  ;;  %v1588_v19 = vld [vmem:[%s1652_s8] ss:$0 sm:$0xff] }
 0x163   : > { %603 = vmatmul.f32.vlgmr.msra.gmra.mxu2 %v559_v20 }
 0x166   : > { %v538_v21 = vpop.f32.mrf.mxu1 }
 0x167   : > { %v539_v22 = vadd.f32 %v1100_v17, %v538_v21 }
 0x169   : > { %v560_v23 = vmax.f32 %v539_v22, 0.0 }
 0x16b   : > { %606 = vmatmul.f32.gmra.mxu2 %v560_v23 }
 0x16e   : > { %v541_v24 = vpop.f32.mrf.mxu1 }
 0x16f   : > { %v542_v25 = vadd.f32 %v1100_v17, %v541_v24 }
 0x171   : > { %v561_v26 = vmax.f32 %v542_v25, 0.0 }
 0x173   : > { %609 = vmatmul.f32.gmra.mxu2 %v561_v26 }
 0x176   : > { %v544_v27 = vpop.f32.mrf.mxu1 }
 0x177   : > { %v545_v28 = vadd.f32 %v1100_v17, %v544_v27 }
 0x179   : > { %v562_v29 = vmax.f32 %v545_v28, 0.0 }
 0x17b   : > { %612 = vmatmul.f32.gmra.mxu2 %v562_v29 }
 0x17e   : > { %v547_v33 = vpop.f32.mrf.mxu1 }
 0x17f   : > { %v548_v34 = vadd.f32 %v1100_v17, %v547_v33 }
 0x181   : > { %v563_v36 = vmax.f32 %v548_v34, 0.0 }
 0x183   : > { %615 = vmatmul.f32.gmra.mxu2 %v563_v36 }
 0x186   : > { %v550_v40 = vpop.f32.mrf.mxu1 }
 0x187   : > { %v551_v41 = vadd.f32 %v1100_v17, %v550_v40 }
 0x189   : > { %v564_v43 = vmax.f32 %v551_v41, 0.0 }
 0x18b   : > { %618 = vmatmul.f32.gmra.mxu2 %v564_v43 }
 0x18e   : > { %v553_v47 = vpop.f32.mrf.mxu1 }
 0x18f   : > { %v554_v48 = vadd.f32 %v1100_v17, %v553_v47 }
 0x191   : > { %v565_v50 = vmax.f32 %v554_v48, 0.0 }
 0x193   : > { %621 = vmatmul.f32.gmra.mxu2 %v565_v50 }
 0x196   : > { %v556_v52 = vpop.f32.mrf.mxu1 }
 0x197   : > { %v557_v53 = vadd.f32 %v1100_v17, %v556_v52 }
 0x199   : > { %v566_v54 = vmax.f32 %v557_v53, 0.0 }
 0x19b   : > { %624 = vmatmul.f32.gmra.mxu2 %v566_v54 }
 0x1e6   : > { %v604_v59 = vpop.f32.mrf.mxu2 }
 0x1e7   : > { %v605_v60 = vadd.f32 %v1101_v58, %v604_v59 }
 0x1e9   : > { %v628_v61 = vmax.f32 %v605_v60, 0.0 }
 0x1eb   : > { %672 = vmatmul.f32.vlgmr.msra.gmra.mxu3 %v628_v61 }
 0x1ee   : > { %v607_v62 = vpop.f32.mrf.mxu2 }
 0x1ef   : > { %v608_v63 = vadd.f32 %v1101_v58, %v607_v62 }
 0x1f1   : > { %v629_v0 = vmax.f32 %v608_v63, 0.0 }
 0x1f3   : > { %675 = vmatmul.f32.gmra.mxu3 %v629_v0 }
 0x1f6   : > { %v610_v1 = vpop.f32.mrf.mxu2 }
 0x1f7   : > { %v611_v2 = vadd.f32 %v1101_v58, %v610_v1 }
 0x1f9   : > { %v630_v3 = vmax.f32 %v611_v2, 0.0 }
 0x1fb   : > { %678 = vmatmul.f32.gmra.mxu3 %v630_v3 }
 0x1fe   : > { %v613_v4 = vpop.f32.mrf.mxu2 }
 0x1ff   : > { %v614_v5 = vadd.f32 %v1101_v58, %v613_v4 }
 0x201   : > { %v631_v6 = vmax.f32 %v614_v5, 0.0 }
 0x203   : > { %681 = vmatmul.f32.gmra.mxu3 %v631_v6 }
 0x206   : > { %v616_v7 = vpop.f32.mrf.mxu2 }
 0x207   : > { %v617_v8 = vadd.f32 %v1101_v58, %v616_v7 }
 0x209   : > { %v632_v9 = vmax.f32 %v617_v8, 0.0 }
 0x20b   : > { %684 = vmatmul.f32.gmra.mxu3 %v632_v9 }
 0x20e   : > { %v619_v10 = vpop.f32.mrf.mxu2 }
 0x20f   : > { %v620_v11 = vadd.f32 %v1101_v58, %v619_v10 }
 0x211   : > { %v633_v12 = vmax.f32 %v620_v11, 0.0 }
 0x213   : > { %687 = vmatmul.f32.gmra.mxu3 %v633_v12 }
 0x216   : > { %v622_v13 = vpop.f32.mrf.mxu2 }
 0x217   : > { %v623_v14 = vadd.f32 %v1101_v58, %v622_v13 }
 0x219   : > { %v634_v15 = vmax.f32 %v623_v14, 0.0 }
 0x21b   : > { %690 = vmatmul.f32.gmra.mxu3 %v634_v15 }
 0x21e   : > { %v625_v16 = vpop.f32.mrf.mxu2 }
 0x21f   : > { %v626_v17 = vadd.f32 %v1101_v58, %v625_v16 }
 0x221   : > { %v635_v18 = vmax.f32 %v626_v17, 0.0 }
 0x223   : > { %693 = vmatmul.f32.gmra.mxu3 %v635_v18 }
 0x26e   : > { %v673_v20 = vpop.f32.mrf.mxu3 }
 0x26f   : > { %v674_v21 = vadd.f32 %v1588_v19, %v673_v20 }
 0x271   : > { %v697_v22 = vsub.f32 0.0, %v674_v21 }
 0x273   : > { %v705_v23 = vmul.f32 1.442695, %v697_v22 }
 0x275   : > { %1103 = vpow2.f32 %v705_v23 }
 0x276   : > { %v676_v24 = vpop.f32.mrf.mxu3 }
 0x277   : > { %v677_v25 = vadd.f32 %v1588_v19, %v676_v24 }
 0x279   : > { %v698_v26 = vsub.f32 0.0, %v677_v25 }
 0x27b   : > { %v1104_v27 = vpop.eup %1103  ;;  %v707_v28 = vmul.f32 1.442695, %v698_v26 }
 0x27c   : > { %v721_v29 = vadd.f32 1.0, %v1104_v27 }
 0x27d   : > { %1105 = vpow2.f32 %v707_v28 }
 0x27e   : > { %1107 = vrcp.f32 %v721_v29  ;;  %v679_v30 = vpop.f32.mrf.mxu3  ;;  %v740_v41 = vand.u32 2147483648, %v721_v29  ;;  %v738_v43 = vand.u32 2147483647, %v721_v29  ;;  %vm734_vm1 = vweird.f32 %v721_v29 }
 0x27f   : > { %v680_v31 = vadd.f32 %v1588_v19, %v679_v30 }
 0x280   : > { %v741_v49 = vor.u32 1.1754944e-38, %v740_v41  ;;  %vm739_vm3 = vcmp.eq.f32.partialorder %v738_v43, 8.507059e+37 }
 0x281   : > { %v699_v32 = vsub.f32 0.0, %v680_v31 }
 0x283   : > { %v1106_v33 = vpop.eup %1105  ;;  %v709_v34 = vmul.f32 1.442695, %v699_v32 }
 0x284   : > { %v1108_v35 = vpop.eup %1107  ;;  %v722_v36 = vadd.f32 1.0, %v1106_v33 }
 0x285   : > { %v730_v37 = vmul.f32 %v1108_v35, %v721_v29  ;;  %1109 = vpow2.f32 %v709_v34  ;;  %vm735_vm0 = vweird.f32 %v1108_v35 }
 0x286   : > { %1111 = vrcp.f32 %v722_v36  ;;  %v682_v38 = vpop.f32.mrf.mxu3  ;;  %vm736_vm2 = vmor %vm734_vm1, %vm735_vm0  ;;  %v755_v57 = vand.u32 2147483648, %v722_v36  ;;  %v753_v59 = vand.u32 2147483647, %v722_v36  ;;  %vm749_vm5 = vweird.f32 %v722_v36 }
 0x287   : > { %v731_v39 = vsub.f32 1.0, %v730_v37  ;;  %v683_v40 = vadd.f32 %v1588_v19, %v682_v38 }
 0x288   : > { %v756_v1 = vor.u32 1.1754944e-38, %v755_v57  ;;  %vm754_vm7 = vcmp.eq.f32.partialorder %v753_v59, 8.507059e+37 }
 0x289   : > { %v732_v42 = vmul.f32 %v1108_v35, %v731_v39  ;;  %v700_v44 = vsub.f32 0.0, %v683_v40 }
 0x28b   : > { %v1110_v45 = vpop.eup %1109  ;;  %v733_v46 = vadd.f32 %v1108_v35, %v732_v42  ;;  %v711_v47 = vmul.f32 1.442695, %v700_v44 }
 0x28c   : > { %v1112_v48 = vpop.eup %1111  ;;  %v723_v50 = vadd.f32 1.0, %v1110_v45 }
 0x28d   : > { %v737_v51 = vsel %vm736_vm2, %v1108_v35, %v733_v46  ;;  %v745_v52 = vmul.f32 %v1112_v48, %v722_v36  ;;  %1113 = vpow2.f32 %v711_v47  ;;  %vm750_vm4 = vweird.f32 %v1112_v48 }
 0x28e   : > { %v742_v53 = vsel %vm739_vm3, %v741_v49, %v737_v51  ;;  %1115 = vrcp.f32 %v723_v50  ;;  %v685_v54 = vpop.f32.mrf.mxu3  ;;  %vm751_vm6 = vmor %vm749_vm5, %vm750_vm4  ;;  %v770_v9 = vand.u32 2147483648, %v723_v50  ;;  %v768_v11 = vand.u32 2147483647, %v723_v50 }
 0x28f   : > { %849 = vst [vmem:[%s1596_s17] sm:$0xff] %v742_v53  ;;  %v746_v55 = vsub.f32 1.0, %v745_v52  ;;  %v686_v56 = vadd.f32 %v1588_v19, %v685_v54  ;;  %vm764_vm9 = vweird.f32 %v723_v50 }
 0x290   : > { %v771_v17 = vor.u32 1.1754944e-38, %v770_v9  ;;  %vm769_vm11 = vcmp.eq.f32.partialorder %v768_v11, 8.507059e+37 }
 0x291   : > { %v747_v58 = vmul.f32 %v1112_v48, %v746_v55  ;;  %v701_v60 = vsub.f32 0.0, %v686_v56 }
 0x293   : > { %v1114_v61 = vpop.eup %1113  ;;  %v748_v62 = vadd.f32 %v1112_v48, %v747_v58  ;;  %v713_v63 = vmul.f32 1.442695, %v701_v60 }
 0x294   : > { %v1116_v0 = vpop.eup %1115  ;;  %v724_v2 = vadd.f32 1.0, %v1114_v61 }
 0x295   : > { %v752_v3 = vsel %vm751_vm6, %v1112_v48, %v748_v62  ;;  %v760_v4 = vmul.f32 %v1116_v0, %v723_v50  ;;  %1117 = vpow2.f32 %v713_v63  ;;  %vm765_vm8 = vweird.f32 %v1116_v0 }
 0x296   : > { %v757_v5 = vsel %vm754_vm7, %v756_v1, %v752_v3  ;;  %1119 = vrcp.f32 %v724_v2  ;;  %v688_v6 = vpop.f32.mrf.mxu3  ;;  %vm766_vm10 = vmor %vm764_vm9, %vm765_vm8  ;;  %v785_v26 = vand.u32 2147483648, %v724_v2  ;;  %v783_v28 = vand.u32 2147483647, %v724_v2 }
 0x297   : > { %850 = vst [vmem:[%s1596_s17 + $0x8] sm:$0xff] %v757_v5  ;;  %v761_v7 = vsub.f32 1.0, %v760_v4  ;;  %v689_v8 = vadd.f32 %v1588_v19, %v688_v6  ;;  %vm779_vm13 = vweird.f32 %v724_v2 }
 0x298   : > { %v786_v34 = vor.u32 1.1754944e-38, %v785_v26  ;;  %vm784_vm15 = vcmp.eq.f32.partialorder %v783_v28, 8.507059e+37 }
 0x299   : > { %v762_v10 = vmul.f32 %v1116_v0, %v761_v7  ;;  %v702_v12 = vsub.f32 0.0, %v689_v8 }
 0x29b   : > { %v1118_v13 = vpop.eup %1117  ;;  %v763_v14 = vadd.f32 %v1116_v0, %v762_v10  ;;  %v715_v15 = vmul.f32 1.442695, %v702_v12 }
 0x29c   : > { %v1120_v16 = vpop.eup %1119  ;;  %v725_v18 = vadd.f32 1.0, %v1118_v13 }
 0x29d   : > { %v767_v20 = vsel %vm766_vm10, %v1116_v0, %v763_v14  ;;  %v775_v21 = vmul.f32 %v1120_v16, %v724_v2  ;;  %1121 = vpow2.f32 %v715_v15  ;;  %vm780_vm12 = vweird.f32 %v1120_v16 }
 0x29e   : > { %v772_v22 = vsel %vm769_vm11, %v771_v17, %v767_v20  ;;  %1123 = vrcp.f32 %v725_v18  ;;  %v691_v23 = vpop.f32.mrf.mxu3  ;;  %vm781_vm14 = vmor %vm779_vm13, %vm780_vm12  ;;  %v800_v42 = vand.u32 2147483648, %v725_v18  ;;  %v798_v44 = vand.u32 2147483647, %v725_v18 }
 0x29f   : > { %851 = vst [vmem:[%s1596_s17 + $0x10] sm:$0xff] %v772_v22  ;;  %v776_v24 = vsub.f32 1.0, %v775_v21  ;;  %v692_v25 = vadd.f32 %v1588_v19, %v691_v23  ;;  %vm794_vm1 = vweird.f32 %v725_v18 }
 0x2a0   : > { %v801_v50 = vor.u32 1.1754944e-38, %v800_v42  ;;  %vm799_vm3 = vcmp.eq.f32.partialorder %v798_v44, 8.507059e+37 }
 0x2a1   : > { %v777_v27 = vmul.f32 %v1120_v16, %v776_v24  ;;  %v703_v29 = vsub.f32 0.0, %v692_v25 }
 0x2a3   : > { %v1122_v30 = vpop.eup %1121  ;;  %v778_v31 = vadd.f32 %v1120_v16, %v777_v27  ;;  %v717_v32 = vmul.f32 1.442695, %v703_v29 }
 0x2a4   : > { %v1124_v33 = vpop.eup %1123  ;;  %v726_v35 = vadd.f32 1.0, %v1122_v30 }
 0x2a5   : > { %v782_v36 = vsel %vm781_vm14, %v1120_v16, %v778_v31  ;;  %v790_v37 = vmul.f32 %v1124_v33, %v725_v18  ;;  %1125 = vpow2.f32 %v717_v32  ;;  %vm795_vm0 = vweird.f32 %v1124_v33 }
 0x2a6   : > { %v787_v38 = vsel %vm784_vm15, %v786_v34, %v782_v36  ;;  %1127 = vrcp.f32 %v726_v35  ;;  %v694_v39 = vpop.f32.mrf.mxu3  ;;  %vm796_vm2 = vmor %vm794_vm1, %vm795_vm0  ;;  %v815_v55 = vand.u32 2147483648, %v726_v35  ;;  %v813_v57 = vand.u32 2147483647, %v726_v35 }
 0x2a7   : > { %852 = vst [vmem:[%s1596_s17 + $0x18] sm:$0xff] %v787_v38  ;;  %v791_v40 = vsub.f32 1.0, %v790_v37  ;;  %v695_v41 = vadd.f32 %v1588_v19, %v694_v39  ;;  %vm809_vm5 = vweird.f32 %v726_v35 }
 0x2a8   : > { %v816_v61 = vor.u32 1.1754944e-38, %v815_v55  ;;  %vm814_vm7 = vcmp.eq.f32.partialorder %v813_v57, 8.507059e+37 }
 0x2a9   : > { %v792_v43 = vmul.f32 %v1124_v33, %v791_v40  ;;  %v704_v45 = vsub.f32 0.0, %v695_v41 }
 0x2ab   : > { %v1126_v46 = vpop.eup %1125  ;;  %v793_v47 = vadd.f32 %v1124_v33, %v792_v43  ;;  %v719_v48 = vmul.f32 1.442695, %v704_v45 }
 0x2ac   : > { %v1128_v49 = vpop.eup %1127  ;;  %v727_v51 = vadd.f32 1.0, %v1126_v46 }
 0x2ad   : > { %v797_v52 = vsel %vm796_vm2, %v1124_v33, %v793_v47  ;;  %v805_v53 = vmul.f32 %v1128_v49, %v726_v35  ;;  %1129 = vpow2.f32 %v719_v48  ;;  %vm810_vm4 = vweird.f32 %v1128_v49 }
 0x2ae   : > { %v802_v54 = vsel %vm799_vm3, %v801_v50, %v797_v52  ;;  %1131 = vrcp.f32 %v727_v51  ;;  %vm811_vm6 = vmor %vm809_vm5, %vm810_vm4  ;;  %v830_v3 = vand.u32 2147483648, %v727_v51  ;;  %v828_v5 = vand.u32 2147483647, %v727_v51 }
 0x2af   : > { %853 = vst [vmem:[%s1596_s17 + $0x20] sm:$0xff] %v802_v54  ;;  %v806_v19 = vsub.f32 1.0, %v805_v53  ;;  %vm824_vm9 = vweird.f32 %v727_v51 }
 0x2b0   : > { %v831_v8 = vor.u32 1.1754944e-38, %v830_v3  ;;  %vm829_vm11 = vcmp.eq.f32.partialorder %v828_v5, 8.507059e+37 }
 0x2b1   : > { %v807_v56 = vmul.f32 %v1128_v49, %v806_v19 }
 0x2b3   : > { %v1130_v58 = vpop.eup %1129  ;;  %v808_v59 = vadd.f32 %v1128_v49, %v807_v56 }
 0x2b4   : > { %v1132_v60 = vpop.eup %1131  ;;  %v728_v62 = vadd.f32 1.0, %v1130_v58 }
 0x2b5   : > { %v812_v63 = vsel %vm811_vm6, %v1128_v49, %v808_v59  ;;  %v820_v0 = vmul.f32 %v1132_v60, %v727_v51  ;;  %vm825_vm8 = vweird.f32 %v1132_v60 }
 0x2b6   : > { %v817_v1 = vsel %vm814_vm7, %v816_v61, %v812_v63  ;;  %1133 = vrcp.f32 %v728_v62  ;;  %vm826_vm10 = vmor %vm824_vm9, %vm825_vm8  ;;  %v845_v13 = vand.u32 2147483648, %v728_v62  ;;  %v843_v15 = vand.u32 2147483647, %v728_v62 }
 0x2b7   : > { %854 = vst [vmem:[%s1596_s17 + $0x28] sm:$0xff] %v817_v1  ;;  %v821_v2 = vsub.f32 1.0, %v820_v0  ;;  %vm839_vm13 = vweird.f32 %v728_v62 }
 0x2b8   : > { %v846_v17 = vor.u32 1.1754944e-38, %v845_v13  ;;  %vm844_vm15 = vcmp.eq.f32.partialorder %v843_v15, 8.507059e+37 }
 0x2b9   : > { %v822_v4 = vmul.f32 %v1132_v60, %v821_v2 }
 0x2bb   : > { %v823_v6 = vadd.f32 %v1132_v60, %v822_v4 }
 0x2bc   : > { %v1134_v7 = vpop.eup %1133 }
 0x2bd   : > { %v827_v9 = vsel %vm826_vm10, %v1132_v60, %v823_v6  ;;  %v835_v10 = vmul.f32 %v1134_v7, %v728_v62  ;;  %vm840_vm12 = vweird.f32 %v1134_v7 }
 0x2be   : > { %v832_v11 = vsel %vm829_vm11, %v831_v8, %v827_v9  ;;  %vm841_vm14 = vmor %vm839_vm13, %vm840_vm12 }
 0x2bf   : > { %855 = vst [vmem:[%s1596_s17 + $0x30] sm:$0xff] %v832_v11  ;;  %v836_v12 = vsub.f32 1.0, %v835_v10 }
 0x2c1   : > { %v837_v14 = vmul.f32 %v1134_v7, %v836_v12 }
 0x2c3   : > { %v838_v16 = vadd.f32 %v1134_v7, %v837_v14 }
 0x2c5   : > { %v842_v18 = vsel %vm841_vm14, %v1134_v7, %v838_v16 }
 0x2c6   : > { %v847_v20 = vsel %vm844_vm15, %v846_v17, %v842_v18 }
 0x2c7   : > { %856 = vst [vmem:[%s1596_s17 + $0x38] sm:$0xff] %v847_v20 }
 0x2c8   : > { %1312 = shalt.err (!%p1309_p10)
}
 0x2c9   : > { %s1367_s24 = smov 128   ;;  %s1368_s17 = smov 8  }
 0x2ca   : > { %1026 = dma.vmem_to_hbm [thread:$0]  (%p1515_p3), %s871_s13, 1024, %s873_s25, %s858_s1, %s1367_s24, %s1367_s24, %s1368_s17  }
 0x2cb PF: > { %s887_s23 = sand.u32 1, %s1347_s30   ;;  %p1670_p12 = scmp.ge.s32.totalorder %s1359_s12, 2 }
 0x2cc   : > { %s888_s26 = scalar_lea.sflag [#allocation4], %s887_s23 }
 0x2cd   : > { %p1046_p13 = pnand %p1670_p12, %p1454_p6 }
 0x2cf   : > { %p1047_p0 = pneg %p1046_p13 }
 0x2d1   : > { %1342 = dma.done.wait (%p1047_p0), %s888_s26, 1024  }
 0x2d2   : > { %1344 = vsyncadd (%p1047_p0), %s888_s26, 4294966272  ;;  %p24_p5 = scmp.ge.s32.totalorder %s1505_s14, 4   ;;  %s1671_s30 = smov %s1351_s10 }
 0x2d3   : > { %s1672_s10 = smov %s1355_s11  ;;  %s1673_s11 = smov %s1521_s22 }
 0x2d4   : > { %s1674_s12 = smov %s1505_s14  ;;  %26 = sbr.rel (!%p24_p5) target bundleno = 11 (0xb), region = 117 }
 0x2d9   :  { %894 = vsyncpa [#allocation3], 1 }
 0x2da   :  { %896 = vsyncpa [#allocation3 + $0x1], 1 }
 0x2db   :  { %897 = vsyncpa [#allocation6], 1 }
 0x2dc   :  { %898 = vsyncpa [#allocation9], 1 }
 0x2dd   :  { %899 = vsyncpa [#allocation4], 1 }
 0x2de   :  { %901 = vsyncpa [#allocation4 + $0x1], 1 }

</bundles_post_ra>
